<compile_context>
chip_gen: v7x
topology: tpu7x:2x2x1
jax: 0.10.0
libtpu: 0.0.40
codegen_flags: <defaults>
</compile_context>

<pallas_src>
import jax
import jax.numpy as jnp
from jax.experimental import pallas as pl
from jax.experimental.pallas import tpu as pltpu


_LANES = 128
_ROW_ALIGN = 32      # sublane multiple that keeps f32 / bf16 / int8 tiles aligned
_ACC_ROWS = 8        # accumulator rows (only 0..3 used) -> clean (8, 128) tile


def _round_up(x, m):
    return ((x + m - 1) // m) * m


def _bce_partials_kernel(pred_ref, y_ref, out_ref):
    """Accumulate per-parallel-chunk lane-wise partials.

    out_ref block is (1, 8, 128) f32, resident across the inner (reduction)
    grid axis.  Row 0: n1 = #(y==1), row 1: n0 = #(y==0),
    row 2: s1 = sum_{y==1} bce, row 3: s0 = sum_{y==0} bce.
    """
    @pl.when(pl.program_id(1) == 0)
    def _init():
        out_ref[...] = jnp.zeros_like(out_ref)

    p = pred_ref[...].astype(jnp.float32)     # (block_rows, 128)
    yv = y_ref[...].astype(jnp.float32)       # (block_rows, 128)

    is1 = (yv == 1.0).astype(jnp.float32)
    is0 = (yv == 0.0).astype(jnp.float32)

    # Single-log BCE with torch's -100 clamp (identical to
    # -(y*log p + (1-y)*log(1-p)) for binary y).  Padded elements (y == -1,
    # p == 0.5) are gated out by is1/is0.
    pt = jnp.where(yv == 1.0, p, 1.0 - p)
    bce = -jnp.maximum(jnp.log(pt), -100.0)

    # Lane-wise partials: reduce only across sublanes here (mostly VPU adds);
    # the cross-lane reduction + weighting happens once in the wrapper.
    out_ref[0, 0:1, :] += jnp.sum(is1, axis=0, keepdims=True)
    out_ref[0, 1:2, :] += jnp.sum(is0, axis=0, keepdims=True)
    out_ref[0, 2:3, :] += jnp.sum(is1 * bce, axis=0, keepdims=True)
    out_ref[0, 3:4, :] += jnp.sum(is0 * bce, axis=0, keepdims=True)


def bce_loss_weighted(pred, y, *, block_rows=4096, parallel_chunks=2):
    """Pallas-TPU equivalent of BCE_loss_weighted.forward(pred, y) -> scalar f32.

    pred: probabilities in (0, 1); trailing singleton dims are squeezed so it
          lines up with y (covers torch's `pred.squeeze()` for (..., 1) preds
          without collapsing a batch of one).
    y:    binary labels {0, 1} (bool / int / float).
    """
    # Strip only trailing size-1 dims of pred (torch squeezes; trailing-only is
    # safer for batch == 1).
    while pred.ndim > y.ndim and pred.shape[-1] == 1:
        pred = jnp.squeeze(pred, axis=-1)
    assert pred.shape == y.shape, (pred.shape, y.shape)

    # Keep narrow dtypes all the way into the kernel (cast after the VMEM
    # load); bool -> int8 only so the padding value -1 is representable.
    if y.dtype == jnp.bool_:
        y = y.astype(jnp.int8)

    total = pred.size
    rows_needed = -(-total // _LANES)

    # Shrink the tile for small inputs to avoid excessive padding.  Default
    # block (4096, 128) f32 = 2 MiB per input per buffer -> 8 MiB double
    # buffered, within default scoped VMEM on v5e/v6e/v7x.
    per_chunk_rows = -(-rows_needed // parallel_chunks)
    block_rows = max(_ROW_ALIGN,
                     min(_round_up(block_rows, _ROW_ALIGN),
                         _round_up(per_chunk_rows, _ROW_ALIGN)))
    rows_padded = _round_up(rows_needed, parallel_chunks * block_rows)
    inner = rows_padded // (parallel_chunks * block_rows)

    pad = rows_padded * _LANES - total
    pred_flat = pred.reshape(-1)
    y_flat = y.reshape(-1)
    if pad:
        # pred pad = 0.5 keeps log() finite; y pad = -1 is neither class, so
        # padded elements contribute nothing to any partial sum.
        pred_flat = jnp.pad(pred_flat, (0, pad), constant_values=0.5)
        y_flat = jnp.pad(y_flat, (0, pad), constant_values=-1)
    pred2d = pred_flat.reshape(rows_padded, _LANES)
    y2d = y_flat.reshape(rows_padded, _LANES)

    parts = pl.pallas_call(
        _bce_partials_kernel,
        out_shape=jax.ShapeDtypeStruct((parallel_chunks, _ACC_ROWS, _LANES),
                                       jnp.float32),
        grid_spec=pltpu.PrefetchScalarGridSpec(
            num_scalar_prefetch=0,
            grid=(parallel_chunks, inner),
            in_specs=[
                pl.BlockSpec((block_rows, _LANES),
                             lambda p, i: (p * inner + i, 0)),
                pl.BlockSpec((block_rows, _LANES),
                             lambda p, i: (p * inner + i, 0)),
            ],
            out_specs=pl.BlockSpec((1, _ACC_ROWS, _LANES),
                                   lambda p, i: (p, 0, 0)),
        ),
        compiler_params=pltpu.CompilerParams(
            dimension_semantics=("parallel", "arbitrary")),
    )(pred2d, y2d)

    # Tiny scalar epilogue: cross-lane + cross-chunk reduction, then weighting.
    sums = jnp.sum(parts, axis=(0, 2))              # (_ACC_ROWS,)
    n1, n0, s1, s0 = sums[0], sums[1], sums[2], sums[3]
    mx = jnp.maximum(n1, n0)
    # Guard the absent-class case: torch indexes weight[y.long()], so an empty
    # class's (infinite) weight is never actually used.
    w1 = jnp.where(n1 > 0, mx / n1, 0.0)
    w0 = jnp.where(n0 > 0, mx / n0, 0.0)
    return (w1 * s1 + w0 * s0) / jnp.float32(total)


def _reference(pred, y):
    """Pure-JAX mirror of the torch module, for verification."""
    while pred.ndim > y.ndim and pred.shape[-1] == 1:
        pred = jnp.squeeze(pred, axis=-1)
    pred = pred.astype(jnp.float32)
    y = y.astype(jnp.float32)
    n1 = jnp.sum((y == 1.0).astype(jnp.float32))
    n0 = jnp.sum((y == 0.0).astype(jnp.float32))
    mx = jnp.maximum(n1, n0)
    weight_ = jnp.where(y == 1.0, mx / n1, mx / n0)
    log_p = jnp.maximum(jnp.log(pred), -100.0)
    log_1mp = jnp.maximum(jnp.log(1.0 - pred), -100.0)
    loss = -(y * log_p + (1.0 - y) * log_1mp)
    return jnp.mean(loss * weight_)


if __name__ == "__main__":
    key = jax.random.PRNGKey(0)
    k1, k2, k3, k4 = jax.random.split(key, 4)

    # Case 1: lane-aligned shapes; pred carries a trailing singleton class dim.
    N, D = 8, 128
    pred1 = jax.random.uniform(k1, (N, D, 1), jnp.float32,
                               minval=1e-4, maxval=1.0 - 1e-4)
    y1 = (jax.random.uniform(k2, (N, D)) > 0.7).astype(jnp.float32)

    # Case 2: ragged total (exercises the pad path inside the wrapper).
    pred2 = jax.random.uniform(k3, (6, 50, 1), jnp.float32,
                               minval=1e-4, maxval=1.0 - 1e-4)
    y2 = (jax.random.uniform(k4, (6, 50)) > 0.4).astype(jnp.float32)

    for pred, y in ((pred1, y1), (pred2, y2)):
        out = jax.block_until_ready(bce_loss_weighted(pred, y))
        ref = jax.block_until_ready(_reference(pred, y))
        assert jnp.allclose(out, ref, rtol=1e-5, atol=1e-5), (out, ref)

    print("KERNEL_OK")
</pallas_src>

<mosaic_0001>
module attributes {stable_mosaic.version = 11 : i64} {
  func.func @_bce_partials_kernel(%arg0: i32, %arg1: i32, %arg2: memref<32x128xf32, #tpu.memory_space<vmem>>, %arg3: memref<32x128xf32, #tpu.memory_space<vmem>>, %arg4: memref<1x8x128xf32, #tpu.memory_space<vmem>>) attributes {dimension_semantics = [#tpu.dimension_semantics<parallel>, #tpu.dimension_semantics<arbitrary>], iteration_bounds = array<i64: 2, 1>, scalar_prefetch = 0 : i64, scratch_operands = 0 : i64, tpu.core_type = #tpu.core_type<tc>, window_params = [{transform_indices = @transform_0, window_bounds = array<i64: 32, 128>}, {transform_indices = @transform_1, window_bounds = array<i64: 32, 128>}, {transform_indices = @transform_2, window_bounds = array<i64: 1, 8, 128>}]} {
    %c0_i32 = arith.constant 0 : i32
    %0 = arith.cmpi eq, %arg1, %c0_i32 : i32
    %1 = arith.extui %0 : i1 to i32
    %c0_i32_0 = arith.constant 0 : i32
    %2 = arith.cmpi ne, %1, %c0_i32_0 : i32
    scf.if %2 {
      %cst_34 = arith.constant 0.000000e+00 : f32
      %57 = vector.broadcast %cst_34 : f32 to vector<1x8x128xf32>
      %c0_35 = arith.constant 0 : index
      %c0_36 = arith.constant 0 : index
      %c0_37 = arith.constant 0 : index
      %58 = vector.load %arg4[%c0_35, %c0_36, %c0_37] : memref<1x8x128xf32, #tpu.memory_space<vmem>>, vector<1x8x128xf32>
      tpu.vector_store %arg4[%c0_35, %c0_36, %c0_37], %57 {strides = array<i32>} : memref<1x8x128xf32, #tpu.memory_space<vmem>>, vector<1x8x128xf32>,
    } else {
    }
    %c0 = arith.constant 0 : index
    %c0_1 = arith.constant 0 : index
    %3 = vector.load %arg2[%c0, %c0_1] : memref<32x128xf32, #tpu.memory_space<vmem>>, vector<32x128xf32>
    %c0_2 = arith.constant 0 : index
    %c0_3 = arith.constant 0 : index
    %4 = vector.load %arg3[%c0_2, %c0_3] : memref<32x128xf32, #tpu.memory_space<vmem>>, vector<32x128xf32>
    %cst = arith.constant 1.000000e+00 : f32
    %5 = vector.broadcast %cst : f32 to vector<32x128xf32>
    %6 = arith.cmpf oeq, %4, %5 : vector<32x128xf32>
    %7 = arith.extui %6 : vector<32x128xi1> to vector<32x128xi32>
    %8 = arith.sitofp %7 : vector<32x128xi32> to vector<32x128xf32>
    %cst_4 = arith.constant 0.000000e+00 : f32
    %9 = vector.broadcast %cst_4 : f32 to vector<32x128xf32>
    %10 = arith.cmpf oeq, %4, %9 : vector<32x128xf32>
    %11 = arith.extui %10 : vector<32x128xi1> to vector<32x128xi32>
    %12 = arith.sitofp %11 : vector<32x128xi32> to vector<32x128xf32>
    %cst_5 = arith.constant 1.000000e+00 : f32
    %13 = vector.broadcast %cst_5 : f32 to vector<32x128xf32>
    %14 = arith.cmpf oeq, %4, %13 : vector<32x128xf32>
    %cst_6 = arith.constant 1.000000e+00 : f32
    %15 = vector.broadcast %cst_6 : f32 to vector<32x128xf32>
    %16 = arith.subf %15, %3 : vector<32x128xf32>
    %17 = arith.select %14, %3, %16 : vector<32x128xi1>, vector<32x128xf32>
    %18 = math.log %17 : vector<32x128xf32>
    %cst_7 = arith.constant -1.000000e+02 : f32
    %19 = vector.broadcast %cst_7 : f32 to vector<32x128xf32>
    %20 = arith.maximumf %18, %19 : vector<32x128xf32>
    %cst_8 = arith.constant 0.000000e+00 : f32
    %21 = vector.broadcast %cst_8 : f32 to vector<32x128xf32>
    %22 = arith.subf %21, %20 : vector<32x128xf32>
    %c0_9 = arith.constant 0 : index
    %c0_10 = arith.constant 0 : index
    %c0_11 = arith.constant 0 : index
    %23 = vector.load %arg4[%c0_9, %c0_10, %c0_11] : memref<1x8x128xf32, #tpu.memory_space<vmem>>, vector<1x1x128xf32>
    %24 = vector.shape_cast %23 : vector<1x1x128xf32> to vector<1x128xf32>
    %cst_12 = arith.constant dense<0.000000e+00> : vector<128xf32>
    %25 = vector.multi_reduction <add>, %8, %cst_12 [0] : vector<32x128xf32> to vector<128xf32>
    %26 = vector.shape_cast %25 : vector<128xf32> to vector<1x128xf32>
    %27 = arith.addf %24, %26 : vector<1x128xf32>
    %c0_13 = arith.constant 0 : index
    %c0_14 = arith.constant 0 : index
    %c0_15 = arith.constant 0 : index
    %28 = vector.load %arg4[%c0_13, %c0_14, %c0_15] : memref<1x8x128xf32, #tpu.memory_space<vmem>>, vector<1x1x128xf32>
    %29 = vector.shape_cast %28 : vector<1x1x128xf32> to vector<1x128xf32>
    %30 = vector.shape_cast %27 : vector<1x128xf32> to vector<1x1x128xf32>
    tpu.vector_store %arg4[%c0_13, %c0_14, %c0_15], %30 {strides = array<i32>} : memref<1x8x128xf32, #tpu.memory_space<vmem>>, vector<1x1x128xf32>,
    %c0_16 = arith.constant 0 : index
    %c1 = arith.constant 1 : index
    %c0_17 = arith.constant 0 : index
    %31 = vector.load %arg4[%c0_16, %c1, %c0_17] : memref<1x8x128xf32, #tpu.memory_space<vmem>>, vector<1x1x128xf32>
    %32 = vector.shape_cast %31 : vector<1x1x128xf32> to vector<1x128xf32>
    %cst_18 = arith.constant dense<0.000000e+00> : vector<128xf32>
    %33 = vector.multi_reduction <add>, %12, %cst_18 [0] : vector<32x128xf32> to vector<128xf32>
    %34 = vector.shape_cast %33 : vector<128xf32> to vector<1x128xf32>
    %35 = arith.addf %32, %34 : vector<1x128xf32>
    %c0_19 = arith.constant 0 : index
    %c1_20 = arith.constant 1 : index
    %c0_21 = arith.constant 0 : index
    %36 = vector.load %arg4[%c0_19, %c1_20, %c0_21] : memref<1x8x128xf32, #tpu.memory_space<vmem>>, vector<1x1x128xf32>
    %37 = vector.shape_cast %36 : vector<1x1x128xf32> to vector<1x128xf32>
    %38 = vector.shape_cast %35 : vector<1x128xf32> to vector<1x1x128xf32>
    tpu.vector_store %arg4[%c0_19, %c1_20, %c0_21], %38 {strides = array<i32>} : memref<1x8x128xf32, #tpu.memory_space<vmem>>, vector<1x1x128xf32>,
    %c0_22 = arith.constant 0 : index
    %c2 = arith.constant 2 : index
    %c0_23 = arith.constant 0 : index
    %39 = vector.load %arg4[%c0_22, %c2, %c0_23] : memref<1x8x128xf32, #tpu.memory_space<vmem>>, vector<1x1x128xf32>
    %40 = vector.shape_cast %39 : vector<1x1x128xf32> to vector<1x128xf32>
    %41 = arith.mulf %8, %22 : vector<32x128xf32>
    %cst_24 = arith.constant dense<0.000000e+00> : vector<128xf32>
    %42 = vector.multi_reduction <add>, %41, %cst_24 [0] : vector<32x128xf32> to vector<128xf32>
    %43 = vector.shape_cast %42 : vector<128xf32> to vector<1x128xf32>
    %44 = arith.addf %40, %43 : vector<1x128xf32>
    %c0_25 = arith.constant 0 : index
    %c2_26 = arith.constant 2 : index
    %c0_27 = arith.constant 0 : index
    %45 = vector.load %arg4[%c0_25, %c2_26, %c0_27] : memref<1x8x128xf32, #tpu.memory_space<vmem>>, vector<1x1x128xf32>
    %46 = vector.shape_cast %45 : vector<1x1x128xf32> to vector<1x128xf32>
    %47 = vector.shape_cast %44 : vector<1x128xf32> to vector<1x1x128xf32>
    tpu.vector_store %arg4[%c0_25, %c2_26, %c0_27], %47 {strides = array<i32>} : memref<1x8x128xf32, #tpu.memory_space<vmem>>, vector<1x1x128xf32>,
    %c0_28 = arith.constant 0 : index
    %c3 = arith.constant 3 : index
    %c0_29 = arith.constant 0 : index
    %48 = vector.load %arg4[%c0_28, %c3, %c0_29] : memref<1x8x128xf32, #tpu.memory_space<vmem>>, vector<1x1x128xf32>
    %49 = vector.shape_cast %48 : vector<1x1x128xf32> to vector<1x128xf32>
    %50 = arith.mulf %12, %22 : vector<32x128xf32>
    %cst_30 = arith.constant dense<0.000000e+00> : vector<128xf32>
    %51 = vector.multi_reduction <add>, %50, %cst_30 [0] : vector<32x128xf32> to vector<128xf32>
    %52 = vector.shape_cast %51 : vector<128xf32> to vector<1x128xf32>
    %53 = arith.addf %49, %52 : vector<1x128xf32>
    %c0_31 = arith.constant 0 : index
    %c3_32 = arith.constant 3 : index
    %c0_33 = arith.constant 0 : index
    %54 = vector.load %arg4[%c0_31, %c3_32, %c0_33] : memref<1x8x128xf32, #tpu.memory_space<vmem>>, vector<1x1x128xf32>
    %55 = vector.shape_cast %54 : vector<1x1x128xf32> to vector<1x128xf32>
    %56 = vector.shape_cast %53 : vector<1x128xf32> to vector<1x1x128xf32>
    tpu.vector_store %arg4[%c0_31, %c3_32, %c0_33], %56 {strides = array<i32>} : memref<1x8x128xf32, #tpu.memory_space<vmem>>, vector<1x1x128xf32>,
    return
  }
  func.func @transform_0(%arg0: i32, %arg1: i32) -> (i32, i32) {
    %c1_i32 = arith.constant 1 : i32
    %0 = arith.muli %arg0, %c1_i32 : i32
    %1 = arith.addi %0, %arg1 : i32
    %c0_i32 = arith.constant 0 : i32
    %c0_i32_0 = arith.constant 0 : i32
    return %1, %c0_i32 : i32, i32
  }
  func.func @transform_1(%arg0: i32, %arg1: i32) -> (i32, i32) {
    %c1_i32 = arith.constant 1 : i32
    %0 = arith.muli %arg0, %c1_i32 : i32
    %1 = arith.addi %0, %arg1 : i32
    %c0_i32 = arith.constant 0 : i32
    %c0_i32_0 = arith.constant 0 : i32
    return %1, %c0_i32 : i32, i32
  }
  func.func @transform_2(%arg0: i32, %arg1: i32) -> (i32, i32, i32) {
    %c0_i32 = arith.constant 0 : i32
    %c0_i32_0 = arith.constant 0 : i32
    %c0_i32_1 = arith.constant 0 : i32
    return %arg0, %c0_i32, %c0_i32_0 : i32, i32, i32
  }
}

</mosaic_0001>

<bundles_post_ra>
// kernel: tpu_custom_call.1
= control target key start
LH: loop header
LB: loop body
LE: loop exit
PB: predicated region body
PF: predicated region fallthrough
CT: control target
= control target key end

     0   :  { %7 = vsyncpa [#allocation3], 0  ;;  %s982_s0 = inlined_call_operand.hbm [shape: f32[64,128], index: 0, kind: input, shape index: {}]   ;;  %s983_s1 = inlined_call_operand.hbm [shape: f32[64,128], index: 1, kind: input, shape index: {}]   ;;  %s984_s2 = inlined_call_operand.hbm [shape: f32[2,8,128], index: 2, kind: output, shape index: {}]  }
   0x1   :  { %9 = vsyncpa [#allocation3 + $0x1], 0 }
   0x2   :  { %10 = vsyncpa [#allocation6], 0 }
   0x3   :  { %12 = vsyncpa [#allocation6 + $0x1], 0 }
   0x4   :  { %13 = vsyncpa [#allocation4], 0 }
   0x5   :  { %15 = vsyncpa [#allocation4 + $0x1], 0  ;;  %s733_s9 = smov 0   ;;  %s735_s10 = smov 0  }
   0x6   :  { %s737_s11 = smov 0   ;;  %s739_s12 = smov 0  }
   0x7   :  { %s741_s13 = smov 0   ;;  %s743_s14 = smov 0  }
   0x8 LB: > { %s458_s15 = sadd.s32 4294967295, %s710_s14   ;;  %s459_s16 = sadd.s32 4294967294, %s710_s14   ;;  %s710_s14 = sphi %s743_s14, %s21_s14   ;;  %s706_s13 = sphi %s741_s13, %s1002_s13   ;;  %s702_s12 = sphi %s739_s12, %s1001_s12   ;;  %s698_s11 = sphi %s737_s11, %s1000_s11   ;;  %s694_s10 = sphi %s735_s10, %s999_s10   ;;  %s690_s9 = sphi %s733_s9, %s998_s9  }
   0x9   : > { %s33_s17 = sadd.s32 1, %s706_s13  ;;  %s42_s18 = sadd.s32 1, %s698_s11 }
   0xa   : > { %p35_p0 = scmp.ge.s32.totalorder %s33_s17, 2  ;;  %p49_p1 = scmp.ne.s32.totalorder %s698_s11, %s694_s10 }
   0xb   : > { %p50_p2 = scmp.eq.s32.totalorder %s710_s14, 0  ;;  %p55_p3 = scmp.ne.s32.totalorder %s694_s10, %s690_s9 }
   0xc   : > { %s1004_s17 = smov (%p35_p0, %s33_s17), 0  ;;  %p56_p5 = scmp.eq.s32.totalorder %s458_s15, 0 }
   0xd   : > { %p774_p4 = por %p50_p2, %p49_p1  ;;  %s39_s20 = ssub.s32 %s706_s13, %s1004_s17 }
   0xe   : > { %p107_p6 = scmp.eq.s32.totalorder %s458_s15, 1  ;;  %p40_p7 = scmp.eq.s32.totalorder %s39_s20, 0 }
   0xf   : > { %p780_p8 = por %p56_p5, %p55_p3  ;;  %p113_p10 = scmp.eq.s32.totalorder %s459_s16, 1 }
  0x10   : > { %p784_p9 = por %p107_p6, %p49_p1  ;;  %p503_p13 = scmp.lt.s32.totalorder %s710_s14, 2 }
  0x11   : > { %s988_s21 = scalar_select %p780_p8, 1, 0 }
  0x12   : > { %s989_s22 = scalar_select %p784_p9, 1, 0 }
  0x13   : > { %s789_s23 = scalar_select %p40_p7, %s698_s11, %s42_s18  }
  0x14   : > { %p791_p11 = por %p113_p10, %p55_p3  ;;  %s798_s25 = sand.u32 1, %s698_s11  }
  0x15   : > { %s462_s26 = sshll.u32 %s798_s25, 5  ;;  %s484_s27 = sshll.u32 %s706_s13, 9 }
  0x16   : > { %s990_s24 = scalar_select %p791_p11, 1, 0 }
  0x17   : > { %s807_s30 = scalar_lea.hbm %s982_s0, %s484_s27  ;;  %s137_s3 = scalar_lea.vmem [#allocation2], %s462_s26 }
  0x18   : > { %s145_s4 = sshll.u32 %s137_s3, 4  ;;  %p815_p0 = pnand %p503_p13, %p774_p4  ;;  %s811_s4 = int_to_ptr.vmem [resolvable:$true] %s145_s4 }
  0x19   : > { %s134_s6 = scalar_lea.sflag [#allocation3], %s798_s25  ;;  %s564_s7 = scalar_lea.hbm %s807_s30, 512 }
  0x1a   : > { %p565_p2 = scmp.ne.s32.totalorder %s807_s30, %s564_s7  ;;  %p566_p3 = pneg %p815_p0 }
  0x1b   : > { %s569_s16 = scalar_lea.hbm %s982_s0, 1024  ;;  %p570_p4 = scmp.lt.u32.totalorder %s807_s30, %s982_s0 }
  0x1c   : > { %p567_p5 = pnand %p566_p3, %p565_p2  ;;  %p571_p7 = scmp.lt.u32.totalorder %s569_s16, %s564_s7 }
  0x1d   : > { %p573_p13 = scmp.lt.u32.totalorder %s564_s7, %s807_s30 }
  0x1e   : > { %p568_p6 = pneg %p567_p5  ;;  %p572_p10 = por %p571_p7, %p570_p4 }
  0x20   : > { %p574_p12 = por %p573_p13, %p572_p10 }
  0x22   : > { %p575_p1 = pnand %p574_p12, %p568_p6 }
  0x24   : > { %578 = shalt.err (!%p575_p1)
}
  0x25   : > { %s579_s20 = scalar_lea.vmem %s811_s4, 512  ;;  %s712_s28 = smov [#allocation2]  }
  0x26   : > { %p580_p2 = scmp.ne.s32.totalorder %s811_s4, %s579_s20  ;;  %s584_s29 = sshll.u32 %s712_s28, 4  ;;  %s585_s29 = int_to_ptr.vmem [resolvable:$false] %s584_s29 }
  0x27   : > { %s586_s3 = scalar_lea.vmem %s585_s29, 1024  ;;  %p587_p9 = scmp.lt.s32.totalorder %s811_s4, %s585_s29 }
  0x28   : > { %p582_p5 = pnand %p580_p2, %p566_p3  ;;  %p588_p4 = scmp.lt.s32.totalorder %s586_s3, %s579_s20 }
  0x2a   : > { %p583_p11 = pneg %p582_p5  ;;  %p589_p7 = por %p588_p4, %p587_p9 }
  0x2c   : > { %p590_p10 = pnand %p589_p7, %p583_p11 }
  0x2e   : > { %593 = shalt.err (!%p590_p10)
}
  0x2f   : > { %s713_s7 = smov 128   ;;  %s714_s8 = smov 8  }
  0x30   : > { %495 = dma.hbm_to_vmem [thread:$0]  (!%p815_p0), %s807_s30, 512, %s811_s4, %s134_s6, %s713_s7, %s713_s7, %s714_s8  }
  0x31   : > { %p175_p9 = scmp.lt.s32.totalorder %s710_s14, 3  ;;  %s857_s18 = scalar_lea.hbm %s983_s1, %s484_s27 }
  0x32   : > { %p992_p11 = scmp.ge.s32.totalorder %s710_s14, 1  ;;  %s159_s20 = scalar_lea.vmem [#allocation5], %s462_s26 }
  0x33   : > { %s167_s28 = sshll.u32 %s159_s20, 4  ;;  %s156_s30 = scalar_lea.sflag [#allocation6], %s798_s25  ;;  %s867_s28 = int_to_ptr.vmem [resolvable:$true] %s167_s28 }
  0x34   : > { %p861_p12 = pnand %p992_p11, %p175_p9  ;;  %s594_s4 = scalar_lea.hbm %s857_s18, 512 }
  0x35   : > { %p595_p1 = scmp.ne.s32.totalorder %s857_s18, %s594_s4  ;;  %s599_s29 = scalar_lea.hbm %s983_s1, 1024 }
  0x36   : > { %p600_p2 = scmp.lt.u32.totalorder %s857_s18, %s983_s1  ;;  %p601_p5 = scmp.lt.u32.totalorder %s599_s29, %s594_s4 }
  0x37   : > { %p597_p6 = pnand %p595_p1, %p566_p3  ;;  %p603_p7 = scmp.lt.u32.totalorder %s594_s4, %s857_s18 }
  0x38   : > { %p602_p4 = por %p601_p5, %p600_p2 }
  0x39   : > { %p598_p13 = pneg %p597_p6 }
  0x3a   : > { %p604_p10 = por %p603_p7, %p602_p4 }
  0x3c   : > { %p605_p9 = pnand %p604_p10, %p598_p13 }
  0x3e   : > { %608 = shalt.err (!%p605_p9)
}
  0x3f   : > { %s609_s26 = scalar_lea.vmem %s867_s28, 512  ;;  %s715_s16 = smov [#allocation5]  }
  0x40   : > { %p610_p11 = scmp.ne.s32.totalorder %s867_s28, %s609_s26  ;;  %s614_s20 = sshll.u32 %s715_s16, 4  ;;  %s615_s20 = int_to_ptr.vmem [resolvable:$false] %s614_s20 }
  0x41   : > { %s616_s27 = scalar_lea.vmem %s615_s20, 1024  ;;  %p617_p8 = scmp.lt.s32.totalorder %s867_s28, %s615_s20 }
  0x42   : > { %p612_p1 = pnand %p610_p11, %p566_p3  ;;  %p618_p2 = scmp.lt.s32.totalorder %s616_s27, %s609_s26 }
  0x44   : > { %p613_p6 = pneg %p612_p1  ;;  %p619_p5 = por %p618_p2, %p617_p8 }
  0x46   : > { %p620_p4 = pnand %p619_p5, %p613_p6 }
  0x48   : > { %623 = shalt.err (!%p620_p4)
}
  0x49   : > { %498 = dma.hbm_to_vmem [thread:$0]  (!%p815_p0), %s857_s18, 512, %s867_s28, %s156_s30, %s713_s7, %s713_s7, %s714_s8  }
  0x4a   : > { %179 = sbr.rel (%p861_p12) target bundleno = 143 (0x8f), region = 28  ;;  %s901_s4 = sand.u32 (!%p861_p12), 1, %s694_s10  }
  0x4b   : > { %s469_s6 = sshll.u32 (!%p861_p12), %s901_s4, 5  ;;  %s182_s29 = scalar_lea.sflag (!%p861_p12), [#allocation3], %s901_s4 }
  0x4c   : > { %s185_s5 = scalar_lea.vmem (!%p861_p12), [#allocation2], %s469_s6  ;;  %p994_p8 = scmp.ne.s32.totalorder (!%p861_p12), %s988_s21, 0 }
  0x51   : > { %677 = dma.done.wait (%p994_p8), %s182_s29, 512  }
  0x52   : > { %679 = vsyncadd (%p994_p8), %s182_s29, 4294966784  ;;  %s191_s25 = scalar_lea.sflag [#allocation6], %s901_s4  ;;  %s194_s7 = scalar_lea.vmem [#allocation5], %s469_s6 }
  0x53   : > { %681 = dma.done.wait (%p994_p8), %s191_s25, 512  }
  0x54   : > { %683 = vsyncadd (%p994_p8), %s191_s25, 4294966784  ;;  %s471_s8 = sshll.u32 %s901_s4, 3  ;;  %v716_v0 = vmov 0.0   ;;  %v229_v1 = vld [vmem:[%s185_s5] sm:$0xff]  ;;  %v230_v2 = vld [vmem:[%s185_s5 + $0x8] sm:$0xff]  ;;  %s481_s21 = sshll.u32 %s702_s12, 7 }
  0x55   : > { %s915_s18 = scalar_lea.vmem [#allocation7], %s471_s8  ;;  %v231_v3 = vld [vmem:[%s185_s5 + $0x10] sm:$0xff]  ;;  %v232_v4 = vld [vmem:[%s185_s5 + $0x18] sm:$0xff]  ;;  %v233_v5 = vld [vmem:[%s194_s7] sm:$0xff]  ;;  %v261_v7 = vsub.f32 1.0, %v229_v1  ;;  %v262_v8 = vsub.f32 1.0, %v230_v2  ;;  %s931_s3 = scalar_lea.hbm %s984_s2, %s481_s21 }
  0x56   : > { %228 = vst [vmem:[%s915_s18] sm:$0xff] %v716_v0  ;;  %v234_v6 = vld [vmem:[%s194_s7 + $0x8] sm:$0xff]  ;;  %v263_v9 = vsub.f32 1.0, %v231_v3  ;;  %v235_v10 = vld [vmem:[%s194_s7 + $0x10] sm:$0xff]  ;;  %v236_v11 = vld [vmem:[%s194_s7 + $0x18] sm:$0xff]  ;;  %vm237_vm0 = vcmp.eq.f32.partialorder %v233_v5, 1.0  ;;  %v264_v12 = vsub.f32 1.0, %v232_v4 }
  0x57   : > { %vm238_vm1 = vcmp.eq.f32.partialorder %v234_v6, 1.0  ;;  %vm239_vm2 = vcmp.eq.f32.partialorder %v235_v10, 1.0  ;;  %vm240_vm3 = vcmp.eq.f32.partialorder %v236_v11, 1.0  ;;  %vm249_vm4 = vcmp.eq.f32.partialorder %v233_v5, 0.0  ;;  %s355_s19 = sshll.u32 %s915_s18, 4  ;;  %s342_s15 = scalar_lea.sflag [#allocation4], %s901_s4  ;;  %s933_s19 = int_to_ptr.vmem [resolvable:$true] %s355_s19 }
  0x58   : > { %v472_v13 = vsel %vm237_vm0, 1.0, %v716_v0  ;;  %v473_v14 = vsel %vm238_vm1, 1.0, %v716_v0  ;;  %v265_v15 = vsel %vm237_vm0, %v229_v1, %v261_v7  ;;  %v266_v16 = vsel %vm238_vm1, %v230_v2, %v262_v8  ;;  %s624_s26 = scalar_lea.vmem %s933_s19, 128  ;;  %p995_p3 = scmp.ne.s32.totalorder %s989_s22, 0 }
  0x59   : > { %v267_v17 = vsel %vm239_vm2, %v231_v3, %v263_v9  ;;  %v268_v18 = vsel %vm240_vm3, %v232_v4, %v264_v12  ;;  %556 = vlog2.f32 %v265_v15  ;;  %v286_v19 = vadd.f32 %v473_v14, %v472_v13  ;;  %p625_p0 = scmp.ne.s32.totalorder %s933_s19, %s624_s26  ;;  %s717_s12 = smov [#allocation7]  }
  0x5a   : > { %v474_v20 = vsel %vm239_vm2, 1.0, %v716_v0  ;;  %558 = vlog2.f32 %v266_v16  ;;  %vm250_vm5 = vcmp.eq.f32.partialorder %v234_v6, 0.0  ;;  %vm251_vm6 = vcmp.eq.f32.partialorder %v235_v10, 0.0  ;;  %s628_s16 = sshll.u32 %s717_s12, 4  ;;  %s629_s16 = int_to_ptr.vmem [resolvable:$false] %s628_s16 }
  0x5b   : > { %560 = vlog2.f32 %v267_v17  ;;  %v287_v21 = vadd.f32 %v474_v20, %v286_v19  ;;  %v476_v22 = vsel %vm249_vm4, 1.0, %v716_v0  ;;  %v477_v23 = vsel %vm250_vm5, 1.0, %v716_v0  ;;  %p626_p12 = pnand %p625_p0, %p995_p3  ;;  %s630_s20 = scalar_lea.vmem %s629_s16, 256 }
  0x5c   : > { %v475_v24 = vsel %vm240_vm3, 1.0, %v716_v0  ;;  %562 = vlog2.f32 %v268_v18  ;;  %vm252_vm7 = vcmp.eq.f32.partialorder %v236_v11, 0.0  ;;  %v298_v25 = vadd.f32 %v477_v23, %v476_v22  ;;  %p631_p7 = scmp.lt.s32.totalorder %s933_s19, %s629_s16  ;;  %p632_p10 = scmp.lt.s32.totalorder %s630_s20, %s624_s26 }
  0x5d   : > { %v288_v26 = vadd.f32 %v475_v24, %v287_v21  ;;  %v478_v27 = vsel %vm251_vm6, 1.0, %v716_v0  ;;  %v479_v30 = vsel %vm252_vm7, 1.0, %v716_v0  ;;  %v285_v49 = vld [vmem:[%s915_s18] sm:$0x1]  ;;  %v297_v61 = vld [vmem:[%s915_s18 + $0x1] sm:$0x1]  ;;  %p627_p13 = pneg %p626_p12 }
  0x5e   : > { %v299_v28 = vadd.f32 %v478_v27, %v298_v25  ;;  %p633_p9 = por %p632_p10, %p631_p7 }
  0x5f   : > { %v289_v29 = vrot.slane %v288_v26, 4 }
  0x60   : > { %v300_v31 = vadd.f32 %v479_v30, %v299_v28  ;;  %p634_p11 = pnand %p633_p9, %p627_p13 }
  0x61   : > { %v290_v32 = vadd.f32 %v289_v29, %v288_v26 }
  0x62   : > { %v301_v33 = vrot.slane %v300_v31, 4 }
  0x63   : > { %v557_v34 = vpop.eup %556  ;;  %v291_v35 = vrot.slane %v290_v32, 2 }
  0x64   : > { %v559_v36 = vpop.eup %558  ;;  %v302_v37 = vadd.f32 %v301_v33, %v300_v31  ;;  %v270_v38 = vmul.f32 0.6931472, %v557_v34 }
  0x65   : > { %v561_v39 = vpop.eup %560  ;;  %v292_v40 = vadd.f32 %v291_v35, %v290_v32  ;;  %v272_v41 = vmul.f32 0.6931472, %v559_v36 }
  0x66   : > { %v563_v42 = vpop.eup %562  ;;  %v303_v43 = vrot.slane %v302_v37, 2  ;;  %v274_v44 = vmul.f32 0.6931472, %v561_v39  ;;  %v277_v45 = vmax.f32 %v270_v38, -100.0 }
  0x67   : > { %v293_v46 = vrot.slane %v292_v40, 1  ;;  %v276_v47 = vmul.f32 0.6931472, %v563_v42  ;;  %v278_v48 = vmax.f32 %v272_v41, -100.0 }
  0x68   : > { %v304_v50 = vadd.f32 %v303_v43, %v302_v37  ;;  %v279_v51 = vmax.f32 %v274_v44, -100.0  ;;  %v281_v52 = vsub.f32 0.0, %v277_v45 }
  0x69   : > { %v294_v53 = vadd.f32 %v293_v46, %v292_v40  ;;  %v280_v54 = vmax.f32 %v276_v47, -100.0  ;;  %v282_v55 = vsub.f32 0.0, %v278_v48 }
  0x6a   : > { %v305_v56 = vrot.slane %v304_v50, 1  ;;  %v283_v57 = vsub.f32 0.0, %v279_v51  ;;  %v310_v58 = vmul.f32 %v472_v13, %v281_v52  ;;  %v326_v59 = vmul.f32 %v476_v22, %v281_v52 }
  0x6b   : > { %v295_v60 = vadd.f32 %v294_v53, %v285_v49  ;;  %v284_v62 = vsub.f32 0.0, %v280_v54  ;;  %v311_v63 = vmul.f32 %v473_v14, %v282_v55  ;;  %v327_v0 = vmul.f32 %v477_v23, %v282_v55  ;;  %v309_v23 = vld [vmem:[%s915_s18 + $0x2] sm:$0x1] }
  0x6c   : > { %v306_v1 = vadd.f32 %v305_v56, %v304_v50  ;;  %v312_v2 = vmul.f32 %v474_v20, %v283_v57  ;;  %v328_v3 = vmul.f32 %v478_v27, %v283_v57 }
  0x6d   : > { %296 = vst [vmem:[%s915_s18] sm:$0x1] %v295_v60  ;;  %v313_v4 = vmul.f32 %v475_v24, %v284_v62  ;;  %v314_v5 = vadd.f32 %v311_v63, %v310_v58  ;;  %v329_v6 = vmul.f32 %v479_v30, %v284_v62  ;;  %v330_v7 = vadd.f32 %v327_v0, %v326_v59  ;;  %v325_v24 = vld [vmem:[%s915_s18 + $0x3] sm:$0x1] }
  0x6e   : > { %v307_v8 = vadd.f32 %v306_v1, %v297_v61 }
  0x6f   : > { %v315_v9 = vadd.f32 %v314_v5, %v312_v2  ;;  %v331_v10 = vadd.f32 %v330_v7, %v328_v3 }
  0x70   : > { %308 = vst [vmem:[%s915_s18 + $0x1] sm:$0x1] %v307_v8 }
  0x71   : > { %v316_v11 = vadd.f32 %v315_v9, %v313_v4  ;;  %v332_v12 = vadd.f32 %v331_v10, %v329_v6 }
  0x73   : > { %v317_v13 = vrot.slane %v316_v11, 4  ;;  %v333_v14 = vrot.slane %v332_v12, 4 }
  0x75   : > { %v318_v15 = vadd.f32 %v317_v13, %v316_v11  ;;  %v334_v16 = vadd.f32 %v333_v14, %v332_v12 }
  0x77   : > { %v319_v17 = vrot.slane %v318_v15, 2  ;;  %v335_v18 = vrot.slane %v334_v16, 2 }
  0x79   : > { %v320_v19 = vadd.f32 %v319_v17, %v318_v15  ;;  %v336_v20 = vadd.f32 %v335_v18, %v334_v16 }
  0x7b   : > { %v321_v21 = vrot.slane %v320_v19, 1  ;;  %v337_v22 = vrot.slane %v336_v20, 1 }
  0x7d   : > { %v322_v25 = vadd.f32 %v321_v21, %v320_v19  ;;  %v338_v26 = vadd.f32 %v337_v22, %v336_v20 }
  0x7f   : > { %v323_v27 = vadd.f32 %v322_v25, %v309_v23  ;;  %v339_v28 = vadd.f32 %v338_v26, %v325_v24 }
  0x81   : > { %324 = vst [vmem:[%s915_s18 + $0x2] sm:$0x1] %v323_v27  ;;  %340 = vst [vmem:[%s915_s18 + $0x3] sm:$0x1] %v339_v28 }
  0x82   : > { %637 = shalt.err (!%p634_p11)
}
  0x83   : > { %s638_s27 = scalar_lea.hbm %s931_s3, 128  ;;  %s642_s29 = scalar_lea.hbm %s984_s2, 256 }
  0x84   : > { %p639_p1 = scmp.ne.s32.totalorder %s931_s3, %s638_s27  ;;  %p643_p5 = scmp.lt.u32.totalorder %s931_s3, %s984_s2 }
  0x85   : > { %p644_p4 = scmp.lt.u32.totalorder %s642_s29, %s638_s27  ;;  %p646_p0 = scmp.lt.u32.totalorder %s638_s27, %s931_s3 }
  0x86   : > { %p640_p6 = pnand %p639_p1, %p995_p3 }
  0x87   : > { %p645_p8 = por %p644_p4, %p643_p5 }
  0x88   : > { %p641_p2 = pneg %p640_p6 }
  0x89   : > { %p647_p12 = por %p646_p0, %p645_p8 }
  0x8b   : > { %p648_p13 = pnand %p647_p12, %p641_p2 }
  0x8d   : > { %651 = shalt.err (!%p648_p13)
}
  0x8e   : > { %490 = dma.vmem_to_hbm [thread:$0]  (%p995_p3), %s933_s19, 128, %s931_s3, %s342_s15  }
  0x8f PF: > { %s367_s7 = sand.u32 1, %s690_s9   ;;  %p996_p7 = scmp.ne.s32.totalorder %s990_s24, 0 }
  0x90   : > { %p997_p10 = scmp.ge.s32.totalorder %s710_s14, 2  ;;  %s368_s8 = scalar_lea.sflag [#allocation4], %s367_s7 }
  0x92   : > { %p500_p9 = pnand %p997_p10, %p996_p7 }
  0x94   : > { %685 = dma.done.wait (!%p500_p9), %s368_s8, 128  }
  0x95   : > { %687 = vsyncadd (!%p500_p9), %s368_s8, 4294967168  ;;  %s21_s14 = sadd.s32 1, %s710_s14   ;;  %s998_s9 = smov %s694_s10 }
  0x96   : > { %p18_p11 = scmp.ge.s32.totalorder %s21_s14, 4   ;;  %s999_s10 = smov %s698_s11 }
  0x97   : > { %s1000_s11 = smov %s789_s23  ;;  %s1001_s12 = smov %s706_s13 }
  0x98   : > { %s1002_s13 = smov %s1004_s17  ;;  %20 = sbr.rel (!%p18_p11) target bundleno = 8 (0x8), region = 90 }
  0x9f   :  { %373 = vsyncpa [#allocation3], 1 }
  0xa0   :  { %375 = vsyncpa [#allocation3 + $0x1], 1 }
  0xa1   :  { %376 = vsyncpa [#allocation6], 1 }
  0xa2   :  { %378 = vsyncpa [#allocation6 + $0x1], 1 }
  0xa3   :  { %379 = vsyncpa [#allocation4], 1 }
  0xa4   :  { %381 = vsyncpa [#allocation4 + $0x1], 1 }

</bundles_post_ra>
